<compile_context>
chip_gen: v5e
topology: v5e:2x2
jax: 0.10.0
libtpu: 0.0.40
codegen_flags: <defaults>
</compile_context>

<pallas_src>
import math
import jax
import jax.numpy as jnp
from jax.experimental import pallas as pl
from jax.experimental.pallas import tpu as pltpu

_OUT = 6        # classifier output features
_IN_HALF = 16   # each party's activation width (concat -> 32)
_TB = 2048      # max batch tile (multiple of 8); amortizes per-step overhead


def _fused_mlp_kernel(xa_ref, xb_ref, wa_ref, wb_ref, b_ref, o_ref):
    # out = xa @ Wa + xb @ Wb + b
    # (concat folded into the weight split; three Linear layers folded into a
    #  single affine map in fuse_params)
    acc = jnp.dot(xa_ref[...], wa_ref[...], preferred_element_type=jnp.float32)
    acc = acc + jnp.dot(xb_ref[...], wb_ref[...],
                        preferred_element_type=jnp.float32)
    o_ref[...] = (acc + b_ref[...]).astype(o_ref.dtype)


def fuse_params(params):
    """One-time algebraic fusion of the three bias-carrying Linear layers.

    Returns (wa, wb, b_fused):
      wa, wb : [16, 6] halves of w1@w2@w3 split along the concat (input) dim,
               so the kernel never concatenates xa/xb.
      b_fused: [1, 6]  fused bias (b1@w2 + b2)@w3 + b3.
    Call once per parameter set (hoisted out of the per-call wrapper).
    """
    w1, b1 = params["w1"], params["b1"]
    w2, b2 = params["w2"], params["b2"]
    w3, b3 = params["w3"], params["b3"]
    w_fused = w1 @ w2 @ w3                      # [32, 6]
    b_fused = (b1 @ w2 + b2) @ w3 + b3          # [1, 6]
    return w_fused[:_IN_HALF, :], w_fused[_IN_HALF:, :], b_fused


def _round_up(x, m):
    return ((x + m - 1) // m) * m


def global_model_ucihar_forward(xa, xb, fused_params):
    """Forward pass of GlobalModelForUCIHAR (fused affine map).

    xa, xb: [B, 16] float32 party activations (== torch.cat([xa, xb], dim=1)).
    fused_params: output of fuse_params(params).
    Returns: [B, 6] float32 logits.
    """
    wa, wb, bf = fused_params
    B = xa.shape[0]

    # Batch tiling: no batch padding; Pallas masks the ragged last block.
    if B <= 8:
        tb = B                       # tiny batch: single full block
    else:
        # Aim for >= 4 grid steps so v7x can shard the parallel axis across
        # its two TensorCores; cap at _TB; tile stays a multiple of 8.
        tb = min(_TB, _round_up(pl.cdiv(B, 4), 8))
    grid = (pl.cdiv(B, tb),)

    return pl.pallas_call(
        _fused_mlp_kernel,
        out_shape=jax.ShapeDtypeStruct((B, _OUT), jnp.float32),
        grid=grid,
        in_specs=[
            pl.BlockSpec((tb, _IN_HALF), lambda i: (i, 0)),    # xa batch tile
            pl.BlockSpec((tb, _IN_HALF), lambda i: (i, 0)),    # xb batch tile
            pl.BlockSpec((_IN_HALF, _OUT), lambda i: (0, 0)),  # Wa (resident)
            pl.BlockSpec((_IN_HALF, _OUT), lambda i: (0, 0)),  # Wb (resident)
            pl.BlockSpec((1, _OUT), lambda i: (0, 0)),         # bias (resident)
        ],
        out_specs=pl.BlockSpec((tb, _OUT), lambda i: (i, 0)),
        compiler_params=pltpu.CompilerParams(
            dimension_semantics=("parallel",)),
    )(xa, xb, wa, wb, bf)


def _init_linear(key, in_features, out_features):
    """nn.Linear-style U(-1/sqrt(fan_in), 1/sqrt(fan_in)), stored as [in, out]."""
    kw, kb = jax.random.split(key)
    bound = 1.0 / math.sqrt(in_features)
    w = jax.random.uniform(kw, (in_features, out_features), jnp.float32,
                           minval=-bound, maxval=bound)
    b = jax.random.uniform(kb, (1, out_features), jnp.float32,
                           minval=-bound, maxval=bound)
    return w, b


def _reference(xa, xb, params):
    x = jnp.concatenate([xa, xb], axis=1)
    return (((x @ params["w1"] + params["b1"]) @ params["w2"] + params["b2"])
            @ params["w3"] + params["b3"])


if __name__ == "__main__":
    key = jax.random.PRNGKey(0)
    k_xa, k_xb, k1, k2, k3, k_big = jax.random.split(key, 6)

    w1, b1 = _init_linear(k1, 32, 32)
    w2, b2 = _init_linear(k2, 32, 16)
    w3, b3 = _init_linear(k3, 16, 6)
    params = {"w1": w1, "b1": b1, "w2": w2, "b2": b2, "w3": w3, "b3": b3}

    # Weight fusion done once per parameter set (hoisted out of the forward).
    fused = fuse_params(params)

    # Small-batch path (single full block, tb == B).
    B = 2
    xa = jax.random.normal(k_xa, (B, 16), jnp.float32)
    xb = jax.random.normal(k_xb, (B, 16), jnp.float32)
    out = jax.block_until_ready(global_model_ucihar_forward(xa, xb, fused))
    ref = _reference(xa, xb, params)
    assert out.shape == (B, 6)
    assert jnp.allclose(out, ref, atol=1e-4, rtol=1e-4)

    # Larger batch: multi-step parallel grid with a ragged (masked) last block,
    # no batch padding (600 -> tb=152, grid=(4,)).
    Bl = 600
    ka, kb = jax.random.split(k_big)
    xal = jax.random.normal(ka, (Bl, 16), jnp.float32)
    xbl = jax.random.normal(kb, (Bl, 16), jnp.float32)
    outl = jax.block_until_ready(global_model_ucihar_forward(xal, xbl, fused))
    refl = _reference(xal, xbl, params)
    assert outl.shape == (Bl, 6)
    assert jnp.allclose(outl, refl, atol=1e-4, rtol=1e-4)

    print("KERNEL_OK")
</pallas_src>

<mosaic_0001>
module attributes {stable_mosaic.version = 11 : i64} {
  func.func @_fused_mlp_kernel(%arg0: i32, %arg1: memref<2x16xf32, #tpu.memory_space<vmem>>, %arg2: memref<2x16xf32, #tpu.memory_space<vmem>>, %arg3: memref<16x6xf32, #tpu.memory_space<vmem>>, %arg4: memref<16x6xf32, #tpu.memory_space<vmem>>, %arg5: memref<1x6xf32, #tpu.memory_space<vmem>>, %arg6: memref<2x6xf32, #tpu.memory_space<vmem>>) attributes {dimension_semantics = [#tpu.dimension_semantics<parallel>], iteration_bounds = array<i64: 1>, scalar_prefetch = 0 : i64, scratch_operands = 0 : i64, tpu.core_type = #tpu.core_type<tc>, window_params = [{transform_indices = @transform_0, window_bounds = array<i64: 2, 16>}, {transform_indices = @transform_1, window_bounds = array<i64: 2, 16>}, {pipeline_mode = #tpu.pipeline_mode<synchronous>, transform_indices = @transform_2, window_bounds = array<i64: 16, 6>}, {pipeline_mode = #tpu.pipeline_mode<synchronous>, transform_indices = @transform_3, window_bounds = array<i64: 16, 6>}, {pipeline_mode = #tpu.pipeline_mode<synchronous>, transform_indices = @transform_4, window_bounds = array<i64: 1, 6>}, {transform_indices = @transform_5, window_bounds = array<i64: 2, 6>}]} {
    %c0 = arith.constant 0 : index
    %c0_0 = arith.constant 0 : index
    %0 = vector.load %arg1[%c0, %c0_0] : memref<2x16xf32, #tpu.memory_space<vmem>>, vector<2x16xf32>
    %c0_1 = arith.constant 0 : index
    %c0_2 = arith.constant 0 : index
    %1 = vector.load %arg3[%c0_1, %c0_2] : memref<16x6xf32, #tpu.memory_space<vmem>>, vector<16x6xf32>
    %cst = arith.constant dense<0.000000e+00> : vector<2x6xf32>
    %2 = tpu.matmul %0, %1, %cst {dimension_numbers = #tpu.dot_dimension_numbers<[1], [0], [0], [1], [0, 0, 1, 1], [], []>} : vector<2x16xf32>, vector<16x6xf32>, vector<2x6xf32> -> vector<2x6xf32>
    %c0_3 = arith.constant 0 : index
    %c0_4 = arith.constant 0 : index
    %3 = vector.load %arg2[%c0_3, %c0_4] : memref<2x16xf32, #tpu.memory_space<vmem>>, vector<2x16xf32>
    %c0_5 = arith.constant 0 : index
    %c0_6 = arith.constant 0 : index
    %4 = vector.load %arg4[%c0_5, %c0_6] : memref<16x6xf32, #tpu.memory_space<vmem>>, vector<16x6xf32>
    %cst_7 = arith.constant dense<0.000000e+00> : vector<2x6xf32>
    %5 = tpu.matmul %3, %4, %cst_7 {dimension_numbers = #tpu.dot_dimension_numbers<[1], [0], [0], [1], [0, 0, 1, 1], [], []>} : vector<2x16xf32>, vector<16x6xf32>, vector<2x6xf32> -> vector<2x6xf32>
    %6 = arith.addf %2, %5 : vector<2x6xf32>
    %c0_8 = arith.constant 0 : index
    %c0_9 = arith.constant 0 : index
    %7 = vector.load %arg5[%c0_8, %c0_9] : memref<1x6xf32, #tpu.memory_space<vmem>>, vector<1x6xf32>
    %8 = vector.broadcast %7 : vector<1x6xf32> to vector<2x6xf32>
    %9 = arith.addf %6, %8 : vector<2x6xf32>
    %c0_10 = arith.constant 0 : index
    %c0_11 = arith.constant 0 : index
    %10 = vector.load %arg6[%c0_10, %c0_11] : memref<2x6xf32, #tpu.memory_space<vmem>>, vector<2x6xf32>
    tpu.vector_store %arg6[%c0_10, %c0_11], %9 {strides = array<i32>} : memref<2x6xf32, #tpu.memory_space<vmem>>, vector<2x6xf32>,
    return
  }
  func.func @transform_0(%arg0: i32) -> (i32, i32) {
    %c0_i32 = arith.constant 0 : i32
    %c0_i32_0 = arith.constant 0 : i32
    return %arg0, %c0_i32 : i32, i32
  }
  func.func @transform_1(%arg0: i32) -> (i32, i32) {
    %c0_i32 = arith.constant 0 : i32
    %c0_i32_0 = arith.constant 0 : i32
    return %arg0, %c0_i32 : i32, i32
  }
  func.func @transform_2(%arg0: i32) -> (i32, i32) {
    %c0_i32 = arith.constant 0 : i32
    %c0_i32_0 = arith.constant 0 : i32
    %c0_i32_1 = arith.constant 0 : i32
    return %c0_i32, %c0_i32_0 : i32, i32
  }
  func.func @transform_3(%arg0: i32) -> (i32, i32) {
    %c0_i32 = arith.constant 0 : i32
    %c0_i32_0 = arith.constant 0 : i32
    %c0_i32_1 = arith.constant 0 : i32
    return %c0_i32, %c0_i32_0 : i32, i32
  }
  func.func @transform_4(%arg0: i32) -> (i32, i32) {
    %c0_i32 = arith.constant 0 : i32
    %c0_i32_0 = arith.constant 0 : i32
    %c0_i32_1 = arith.constant 0 : i32
    return %c0_i32, %c0_i32_0 : i32, i32
  }
  func.func @transform_5(%arg0: i32) -> (i32, i32) {
    %c0_i32 = arith.constant 0 : i32
    %c0_i32_0 = arith.constant 0 : i32
    return %arg0, %c0_i32 : i32, i32
  }
}

</mosaic_0001>

<bundles_post_ra>
// kernel: tpu_custom_call.1
= control target key start
LH: loop header
LB: loop body
LE: loop exit
PB: predicated region body
PF: predicated region fallthrough
CT: control target
= control target key end

     0   :  { %vm27_vm0 = vcmask 130048   ;;  %s182_s0 = inlined_call_operand.vmem [shape: f32[2,16], index: 0, kind: input, shape index: {}]   ;;  %s183_s1 = inlined_call_operand.vmem [shape: f32[2,16], index: 1, kind: input, shape index: {}]   ;;  %s184_s2 = inlined_call_operand.vmem [shape: f32[16,6], index: 2, kind: input, shape index: {}]   ;;  %s185_s3 = inlined_call_operand.vmem [shape: f32[16,6], index: 3, kind: input, shape index: {}]   ;;  %s186_s4 = inlined_call_operand.vmem [shape: f32[1,6], index: 4, kind: input, shape index: {}]   ;;  %s187_s5 = inlined_call_operand.hbm [shape: f32[2,6], index: 5, kind: output, shape index: {}]  }
   0x1   :  { %v26_v0 = vld [vmem:[%s185_s3 + $0x8] sm:$0xff]  ;;  %v25_v2 = vld [vmem:[%s185_s3] sm:$0xff] }
   0x2   :  { %v23_v1 = vld [vmem:[%s184_s2 + $0x8] sm:$0xff]  ;;  %45 = vmatpush.msra.mxu0 %v26_v0  ;;  %v22_v3 = vld [vmem:[%s184_s2] sm:$0xff] }
   0x3   :  { %68 = vmatpush.msra.mxu1 %v23_v1  ;;  %v24_v4 = vld [vmem:[%s183_s1] sm:$0x3] }
   0x4   :  { %v21_v5 = vld [vmem:[%s182_s0] sm:$0x3] }
   0x5   :  { %10 = vsyncpa [#allocation3], 0  ;;  %46 = vmatpush.msra.mxu0 %v25_v2  ;;  %69 = vmatpush.msra.mxu1 %v22_v3  ;;  %v100_v6 = vld [vmem:[%s186_s4] ss:$0 sm:$0xff]  ;;  %s127_s2 = smov [#allocation2]   ;;  %s88_s8 = sshll.u32 %s187_s5, 4  ;;  %s89_s8 = int_to_ptr.hbm [resolvable:$true] %s88_s8 }
   0x6   :  { %97 = vmatmul.msk.f32.vlgmr.msra.gmra.mxu0 %vm27_vm0, %v24_v4  ;;  %98 = vmatmul.msk.f32.vlgmr.msra.gmra.mxu1 %vm27_vm0, %v21_v5  ;;  %s86_s6 = sshll.u32 %s127_s2, 4  ;;  %vm79_vm1 = vcmask 41984   ;;  %s87_s6 = int_to_ptr.vmem [resolvable:$true] %s86_s6 }
  0x83   :  { %v48_v7 = vpop.f32.mrf.mxu0  ;;  %v71_v8 = vpop.f32.mrf.mxu1 }
  0x84   :  { %v72_v9 = vadd.f32 %v71_v8, %v48_v7 }
  0x86   :  { %v78_v10 = vadd.f32 %v100_v6, %v72_v9 }
  0x88   :  { %80 = vst.msk [vmem:[#allocation2] sm:$0x3] %vm79_vm1, %v78_v10 }
  0x89   :  { %91 = dma.vmem_to_hbm [thread:$0]  %s87_s6, 32, %s89_s8, [#allocation3]  }
  0x8a   :  { %125 = dma.done.wait [#allocation3], 32  }
  0x8b   :  { %126 = vsyncadd [#allocation3], 4294967264 }
  0x8c   :  { %96 = vsyncpa [#allocation3], 1 }

</bundles_post_ra>
